<compile_context>
chip_gen: v5e
topology: v5e:2x2
jax: 0.10.0
libtpu: 0.0.40
codegen_flags: <defaults>
</compile_context>

<pallas_src>
import functools

import jax
import jax.numpy as jnp
from jax.experimental import pallas as pl
from jax.experimental.pallas import tpu as pltpu

EPS = 1e-5  # nn.LayerNorm default


def _round_up(n, m):
    return ((n + m - 1) // m) * m


def _prenorm_fn_kernel(x_ref, c_ref, gx_ref, bx_ref, gc_ref, bc_ref,
                       w_ref, b_ref, o_ref, nrm_ref, *, d_x):
    # LayerNorms are computed once per row tile (on the first Do-column step)
    # and stashed, concatenated along the lane axis, in VMEM scratch.
    @pl.when(pl.program_id(1) == 0)
    def _():
        # --- LayerNorm(x) over the last dim (biased variance, like PyTorch) ---
        x = x_ref[...].astype(jnp.float32)
        mu = jnp.mean(x, axis=-1, keepdims=True)
        xc = x - mu
        var = jnp.mean(xc * xc, axis=-1, keepdims=True)
        # Fused affine: one multiply by (rsqrt * gamma), one add of beta.
        xn = xc * (jax.lax.rsqrt(var + EPS) * gx_ref[...]) + bx_ref[...]

        # --- LayerNorm(context) over the last dim ---
        c = c_ref[...].astype(jnp.float32)
        cmu = jnp.mean(c, axis=-1, keepdims=True)
        cc = c - cmu
        cvar = jnp.mean(cc * cc, axis=-1, keepdims=True)
        cn = cc * (jax.lax.rsqrt(cvar + EPS) * gc_ref[...]) + bc_ref[...]

        nrm_ref[:, :d_x] = xn.astype(nrm_ref.dtype)
        nrm_ref[:, d_x:] = cn.astype(nrm_ref.dtype)

    # --- fn(x_normed, context_normed): single fused K = D + Dc matmul ---
    out = jnp.dot(nrm_ref[...], w_ref[...], preferred_element_type=jnp.float32)
    o_ref[...] = (out + b_ref[...]).astype(o_ref.dtype)


def prenorm_forward(x, context, params, *, row_tile=256, col_tile=256,
                    vmem_limit_bytes=64 * 1024 * 1024):
    """x: (B, S, D), context: (B, S, Dc) -> (B, S, Do)."""
    B, S, D = x.shape
    _, _, Dc = context.shape
    Do = params["w"].shape[1]

    N = B * S
    x2 = x.reshape(N, D)
    c2 = context.reshape(N, Dc)

    # 2-D (1, D) views so the params satisfy TPU block-shape constraints.
    gx = params["gamma_x"].reshape(1, D)
    bx = params["beta_x"].reshape(1, D)
    gc = params["gamma_c"].reshape(1, Dc)
    bc = params["beta_c"].reshape(1, Dc)
    b = params["b"].reshape(1, Do)

    # Fuse the two fn matmuls into one contraction over K = D + Dc.
    w_cat = jnp.concatenate([params["w"], params["wc"]], axis=0)  # (D+Dc, Do)

    # MXU operands drop to bf16 only when the weights are bf16; LN stays f32.
    mxu_dtype = jnp.bfloat16 if w_cat.dtype == jnp.bfloat16 else jnp.float32

    # Row (M) tile: multiple of the sublane packing, clamped to N's extent.
    sub = 16 if x.dtype == jnp.bfloat16 else 8
    rt = max(sub, min(_round_up(row_tile, sub), _round_up(N, sub)))
    # Output-column (lane) tile: lane-dense divisor of Do, else full width.
    ct = col_tile if (Do % col_tile == 0) else Do

    grid = (pl.cdiv(N, rt), pl.cdiv(Do, ct))

    kernel = functools.partial(_prenorm_fn_kernel, d_x=D)

    out = pl.pallas_call(
        kernel,
        out_shape=jax.ShapeDtypeStruct((N, Do), x.dtype),
        grid_spec=pltpu.PrefetchScalarGridSpec(
            num_scalar_prefetch=0,
            grid=grid,
            in_specs=[
                pl.BlockSpec((rt, D), lambda i, j: (i, 0)),       # x rows
                pl.BlockSpec((rt, Dc), lambda i, j: (i, 0)),      # context rows
                pl.BlockSpec((1, D), lambda i, j: (0, 0)),        # gamma_x
                pl.BlockSpec((1, D), lambda i, j: (0, 0)),        # beta_x
                pl.BlockSpec((1, Dc), lambda i, j: (0, 0)),       # gamma_c
                pl.BlockSpec((1, Dc), lambda i, j: (0, 0)),       # beta_c
                pl.BlockSpec((D + Dc, ct), lambda i, j: (0, j)),  # [W; Wc] col tile
                pl.BlockSpec((1, ct), lambda i, j: (0, j)),       # bias col tile
            ],
            out_specs=pl.BlockSpec((rt, ct), lambda i, j: (i, j)),
            scratch_shapes=[pltpu.VMEM((rt, D + Dc), mxu_dtype)],
        ),
        compiler_params=pltpu.CompilerParams(
            dimension_semantics=("parallel", "arbitrary"),
            vmem_limit_bytes=vmem_limit_bytes),
    )(x2, c2, gx, bx, gc, bc, w_cat, b)

    return out.reshape(B, S, Do)


def prenorm_reference(x, context, params):
    """Pure-JAX reference mirroring the PyTorch PreNorm.forward semantics."""
    def ln(v, g, b_):
        mu = jnp.mean(v, axis=-1, keepdims=True)
        var = jnp.mean((v - mu) ** 2, axis=-1, keepdims=True)
        return (v - mu) / jnp.sqrt(var + EPS) * g + b_

    xn = ln(x, params["gamma_x"], params["beta_x"])
    cn = ln(context, params["gamma_c"], params["beta_c"])
    # fn(x, context=cn)
    return xn @ params["w"] + cn @ params["wc"] + params["b"]


def _make_params(key, D, Dc, Do):
    kw, kwc, kb, kgx, kbx, kgc, kbc = jax.random.split(key, 7)
    return {
        # LayerNorm affine params (non-trivial to exercise the fused affine)
        "gamma_x": 1.0 + 0.1 * jax.random.normal(kgx, (D,), jnp.float32),
        "beta_x": 0.1 * jax.random.normal(kbx, (D,), jnp.float32),
        "gamma_c": 1.0 + 0.1 * jax.random.normal(kgc, (Dc,), jnp.float32),
        "beta_c": 0.1 * jax.random.normal(kbc, (Dc,), jnp.float32),
        # fn = linear consuming (x, context)
        "w": jax.random.normal(kw, (D, Do), jnp.float32) * 0.1,
        "wc": jax.random.normal(kwc, (Dc, Do), jnp.float32) * 0.1,
        "b": jax.random.normal(kb, (Do,), jnp.float32) * 0.1,
    }


if __name__ == "__main__":
    # Small but lane-dense toy shapes (feature dims multiples of 128).
    B, S, D, Dc, Do = 2, 8, 128, 128, 128

    key = jax.random.PRNGKey(0)
    kx, kc, kp = jax.random.split(key, 3)

    x = jax.random.normal(kx, (B, S, D), dtype=jnp.float32)
    context = jax.random.normal(kc, (B, S, Dc), dtype=jnp.float32)
    params = _make_params(kp, D, Dc, Do)

    out = prenorm_forward(x, context, params)
    out = jax.block_until_ready(out)

    ref = prenorm_reference(x, context, params)
    assert out.shape == (B, S, Do)
    assert jnp.allclose(out, ref, atol=1e-4, rtol=1e-4), (
        f"max err {jnp.max(jnp.abs(out - ref))}")

    # Ragged-tail check: N not a multiple of the row tile (stores are clipped).
    S2 = 5
    x2 = jax.random.normal(kx, (B, S2, D), dtype=jnp.float32)
    c2 = jax.random.normal(kc, (B, S2, Dc), dtype=jnp.float32)
    out2 = jax.block_until_ready(prenorm_forward(x2, c2, params))
    ref2 = prenorm_reference(x2, c2, params)
    assert jnp.allclose(out2, ref2, atol=1e-4, rtol=1e-4), (
        f"ragged max err {jnp.max(jnp.abs(out2 - ref2))}")

    print("KERNEL_OK")
</pallas_src>

<mosaic_0001>
module attributes {stable_mosaic.version = 11 : i64} {
  func.func @_prenorm_fn_kernel(%arg0: i32, %arg1: i32, %arg2: memref<16x128xf32, #tpu.memory_space<vmem>>, %arg3: memref<16x128xf32, #tpu.memory_space<vmem>>, %arg4: memref<1x128xf32, #tpu.memory_space<vmem>>, %arg5: memref<1x128xf32, #tpu.memory_space<vmem>>, %arg6: memref<1x128xf32, #tpu.memory_space<vmem>>, %arg7: memref<1x128xf32, #tpu.memory_space<vmem>>, %arg8: memref<256x128xf32, #tpu.memory_space<vmem>>, %arg9: memref<1x128xf32, #tpu.memory_space<vmem>>, %arg10: memref<16x128xf32, #tpu.memory_space<vmem>>, %arg11: memref<16x256xf32, #tpu.memory_space<vmem>>) attributes {dimension_semantics = [#tpu.dimension_semantics<parallel>, #tpu.dimension_semantics<arbitrary>], iteration_bounds = array<i64: 1, 1>, scalar_prefetch = 0 : i64, scratch_operands = 1 : i64, tpu.core_type = #tpu.core_type<tc>, window_params = [{transform_indices = @transform_0, window_bounds = array<i64: 16, 128>}, {transform_indices = @transform_1, window_bounds = array<i64: 16, 128>}, {pipeline_mode = #tpu.pipeline_mode<synchronous>, transform_indices = @transform_2, window_bounds = array<i64: 1, 128>}, {pipeline_mode = #tpu.pipeline_mode<synchronous>, transform_indices = @transform_3, window_bounds = array<i64: 1, 128>}, {pipeline_mode = #tpu.pipeline_mode<synchronous>, transform_indices = @transform_4, window_bounds = array<i64: 1, 128>}, {pipeline_mode = #tpu.pipeline_mode<synchronous>, transform_indices = @transform_5, window_bounds = array<i64: 1, 128>}, {transform_indices = @transform_6, window_bounds = array<i64: 256, 128>}, {transform_indices = @transform_7, window_bounds = array<i64: 1, 128>}, {transform_indices = @transform_8, window_bounds = array<i64: 16, 128>}]} {
    %c0_i32 = arith.constant 0 : i32
    %0 = arith.cmpi eq, %arg1, %c0_i32 : i32
    %1 = arith.extui %0 : i1 to i32
    %c0_i32_0 = arith.constant 0 : i32
    %2 = arith.cmpi ne, %1, %c0_i32_0 : i32
    scf.if %2 {
      %c0_8 = arith.constant 0 : index
      %c0_9 = arith.constant 0 : index
      %10 = vector.load %arg2[%c0_8, %c0_9] : memref<16x128xf32, #tpu.memory_space<vmem>>, vector<16x128xf32>
      %cst_10 = arith.constant dense<0.000000e+00> : vector<16xf32>
      %11 = vector.multi_reduction <add>, %10, %cst_10 [1] : vector<16x128xf32> to vector<16xf32>
      %12 = vector.shape_cast %11 : vector<16xf32> to vector<16x1xf32>
      %cst_11 = arith.constant 1.280000e+02 : f32
      %13 = vector.broadcast %cst_11 : f32 to vector<16x1xf32>
      %14 = arith.divf %12, %13 : vector<16x1xf32>
      %15 = vector.broadcast %14 : vector<16x1xf32> to vector<16x128xf32>
      %16 = arith.subf %10, %15 : vector<16x128xf32>
      %17 = arith.mulf %16, %16 : vector<16x128xf32>
      %cst_12 = arith.constant dense<0.000000e+00> : vector<16xf32>
      %18 = vector.multi_reduction <add>, %17, %cst_12 [1] : vector<16x128xf32> to vector<16xf32>
      %19 = vector.shape_cast %18 : vector<16xf32> to vector<16x1xf32>
      %cst_13 = arith.constant 1.280000e+02 : f32
      %20 = vector.broadcast %cst_13 : f32 to vector<16x1xf32>
      %21 = arith.divf %19, %20 : vector<16x1xf32>
      %cst_14 = arith.constant 9.99999974E-6 : f32
      %22 = vector.broadcast %cst_14 : f32 to vector<16x1xf32>
      %23 = arith.addf %21, %22 : vector<16x1xf32>
      %24 = math.rsqrt %23 : vector<16x1xf32>
      %c0_15 = arith.constant 0 : index
      %c0_16 = arith.constant 0 : index
      %25 = vector.load %arg4[%c0_15, %c0_16] : memref<1x128xf32, #tpu.memory_space<vmem>>, vector<1x128xf32>
      %26 = vector.broadcast %24 : vector<16x1xf32> to vector<16x128xf32>
      %27 = vector.broadcast %25 : vector<1x128xf32> to vector<16x128xf32>
      %28 = arith.mulf %26, %27 : vector<16x128xf32>
      %29 = arith.mulf %16, %28 : vector<16x128xf32>
      %c0_17 = arith.constant 0 : index
      %c0_18 = arith.constant 0 : index
      %30 = vector.load %arg5[%c0_17, %c0_18] : memref<1x128xf32, #tpu.memory_space<vmem>>, vector<1x128xf32>
      %31 = vector.broadcast %30 : vector<1x128xf32> to vector<16x128xf32>
      %32 = arith.addf %29, %31 : vector<16x128xf32>
      %c0_19 = arith.constant 0 : index
      %c0_20 = arith.constant 0 : index
      %33 = vector.load %arg3[%c0_19, %c0_20] : memref<16x128xf32, #tpu.memory_space<vmem>>, vector<16x128xf32>
      %cst_21 = arith.constant dense<0.000000e+00> : vector<16xf32>
      %34 = vector.multi_reduction <add>, %33, %cst_21 [1] : vector<16x128xf32> to vector<16xf32>
      %35 = vector.shape_cast %34 : vector<16xf32> to vector<16x1xf32>
      %cst_22 = arith.constant 1.280000e+02 : f32
      %36 = vector.broadcast %cst_22 : f32 to vector<16x1xf32>
      %37 = arith.divf %35, %36 : vector<16x1xf32>
      %38 = vector.broadcast %37 : vector<16x1xf32> to vector<16x128xf32>
      %39 = arith.subf %33, %38 : vector<16x128xf32>
      %40 = arith.mulf %39, %39 : vector<16x128xf32>
      %cst_23 = arith.constant dense<0.000000e+00> : vector<16xf32>
      %41 = vector.multi_reduction <add>, %40, %cst_23 [1] : vector<16x128xf32> to vector<16xf32>
      %42 = vector.shape_cast %41 : vector<16xf32> to vector<16x1xf32>
      %cst_24 = arith.constant 1.280000e+02 : f32
      %43 = vector.broadcast %cst_24 : f32 to vector<16x1xf32>
      %44 = arith.divf %42, %43 : vector<16x1xf32>
      %cst_25 = arith.constant 9.99999974E-6 : f32
      %45 = vector.broadcast %cst_25 : f32 to vector<16x1xf32>
      %46 = arith.addf %44, %45 : vector<16x1xf32>
      %47 = math.rsqrt %46 : vector<16x1xf32>
      %c0_26 = arith.constant 0 : index
      %c0_27 = arith.constant 0 : index
      %48 = vector.load %arg6[%c0_26, %c0_27] : memref<1x128xf32, #tpu.memory_space<vmem>>, vector<1x128xf32>
      %49 = vector.broadcast %47 : vector<16x1xf32> to vector<16x128xf32>
      %50 = vector.broadcast %48 : vector<1x128xf32> to vector<16x128xf32>
      %51 = arith.mulf %49, %50 : vector<16x128xf32>
      %52 = arith.mulf %39, %51 : vector<16x128xf32>
      %c0_28 = arith.constant 0 : index
      %c0_29 = arith.constant 0 : index
      %53 = vector.load %arg7[%c0_28, %c0_29] : memref<1x128xf32, #tpu.memory_space<vmem>>, vector<1x128xf32>
      %54 = vector.broadcast %53 : vector<1x128xf32> to vector<16x128xf32>
      %55 = arith.addf %52, %54 : vector<16x128xf32>
      %c0_30 = arith.constant 0 : index
      %c0_31 = arith.constant 0 : index
      %56 = vector.load %arg11[%c0_30, %c0_31] : memref<16x256xf32, #tpu.memory_space<vmem>>, vector<16x128xf32>
      tpu.vector_store %arg11[%c0_30, %c0_31], %32 {strides = array<i32>} : memref<16x256xf32, #tpu.memory_space<vmem>>, vector<16x128xf32>,
      %c0_32 = arith.constant 0 : index
      %c128 = arith.constant 128 : index
      %57 = vector.load %arg11[%c0_32, %c128] : memref<16x256xf32, #tpu.memory_space<vmem>>, vector<16x128xf32>
      tpu.vector_store %arg11[%c0_32, %c128], %55 {strides = array<i32>} : memref<16x256xf32, #tpu.memory_space<vmem>>, vector<16x128xf32>,
    } else {
    }
    %c0 = arith.constant 0 : index
    %c0_1 = arith.constant 0 : index
    %3 = vector.load %arg11[%c0, %c0_1] : memref<16x256xf32, #tpu.memory_space<vmem>>, vector<16x256xf32>
    %c0_2 = arith.constant 0 : index
    %c0_3 = arith.constant 0 : index
    %4 = vector.load %arg8[%c0_2, %c0_3] : memref<256x128xf32, #tpu.memory_space<vmem>>, vector<256x128xf32>
    %cst = arith.constant dense<0.000000e+00> : vector<16x128xf32>
    %5 = tpu.matmul %3, %4, %cst {dimension_numbers = #tpu.dot_dimension_numbers<[1], [0], [0], [1], [0, 0, 1, 1], [], []>} : vector<16x256xf32>, vector<256x128xf32>, vector<16x128xf32> -> vector<16x128xf32>
    %c0_4 = arith.constant 0 : index
    %c0_5 = arith.constant 0 : index
    %6 = vector.load %arg9[%c0_4, %c0_5] : memref<1x128xf32, #tpu.memory_space<vmem>>, vector<1x128xf32>
    %7 = vector.broadcast %6 : vector<1x128xf32> to vector<16x128xf32>
    %8 = arith.addf %5, %7 : vector<16x128xf32>
    %c0_6 = arith.constant 0 : index
    %c0_7 = arith.constant 0 : index
    %9 = vector.load %arg10[%c0_6, %c0_7] : memref<16x128xf32, #tpu.memory_space<vmem>>, vector<16x128xf32>
    tpu.vector_store %arg10[%c0_6, %c0_7], %8 {strides = array<i32>} : memref<16x128xf32, #tpu.memory_space<vmem>>, vector<16x128xf32>,
    return
  }
  func.func @transform_0(%arg0: i32, %arg1: i32) -> (i32, i32) {
    %c0_i32 = arith.constant 0 : i32
    %c0_i32_0 = arith.constant 0 : i32
    return %arg0, %c0_i32 : i32, i32
  }
  func.func @transform_1(%arg0: i32, %arg1: i32) -> (i32, i32) {
    %c0_i32 = arith.constant 0 : i32
    %c0_i32_0 = arith.constant 0 : i32
    return %arg0, %c0_i32 : i32, i32
  }
  func.func @transform_2(%arg0: i32, %arg1: i32) -> (i32, i32) {
    %c0_i32 = arith.constant 0 : i32
    %c0_i32_0 = arith.constant 0 : i32
    %c0_i32_1 = arith.constant 0 : i32
    return %c0_i32, %c0_i32_0 : i32, i32
  }
  func.func @transform_3(%arg0: i32, %arg1: i32) -> (i32, i32) {
    %c0_i32 = arith.constant 0 : i32
    %c0_i32_0 = arith.constant 0 : i32
    %c0_i32_1 = arith.constant 0 : i32
    return %c0_i32, %c0_i32_0 : i32, i32
  }
  func.func @transform_4(%arg0: i32, %arg1: i32) -> (i32, i32) {
    %c0_i32 = arith.constant 0 : i32
    %c0_i32_0 = arith.constant 0 : i32
    %c0_i32_1 = arith.constant 0 : i32
    return %c0_i32, %c0_i32_0 : i32, i32
  }
  func.func @transform_5(%arg0: i32, %arg1: i32) -> (i32, i32) {
    %c0_i32 = arith.constant 0 : i32
    %c0_i32_0 = arith.constant 0 : i32
    %c0_i32_1 = arith.constant 0 : i32
    return %c0_i32, %c0_i32_0 : i32, i32
  }
  func.func @transform_6(%arg0: i32, %arg1: i32) -> (i32, i32) {
    %c0_i32 = arith.constant 0 : i32
    %c0_i32_0 = arith.constant 0 : i32
    return %c0_i32, %arg1 : i32, i32
  }
  func.func @transform_7(%arg0: i32, %arg1: i32) -> (i32, i32) {
    %c0_i32 = arith.constant 0 : i32
    %c0_i32_0 = arith.constant 0 : i32
    return %c0_i32, %arg1 : i32, i32
  }
  func.func @transform_8(%arg0: i32, %arg1: i32) -> (i32, i32) {
    %c0_i32 = arith.constant 0 : i32
    return %arg0, %arg1 : i32, i32
  }
}

</mosaic_0001>

<bundles_post_ra>
// kernel: tpu_custom_call.1
= control target key start
LH: loop header
LB: loop body
LE: loop exit
PB: predicated region body
PF: predicated region fallthrough
CT: control target
= control target key end

     0   :  { %13 = vsyncpa [#allocation4], 0  ;;  %s585_s0 = inlined_call_operand.hbm [shape: f32[16,128], index: 0, kind: input, shape index: {}]   ;;  %s586_s1 = inlined_call_operand.hbm [shape: f32[16,128], index: 1, kind: input, shape index: {}]   ;;  %s587_s2 = inlined_call_operand.vmem [shape: f32[1,128], index: 2, kind: input, shape index: {}]   ;;  %s588_s3 = inlined_call_operand.vmem [shape: f32[1,128], index: 3, kind: input, shape index: {}]   ;;  %s589_s4 = inlined_call_operand.vmem [shape: f32[1,128], index: 4, kind: input, shape index: {}]   ;;  %s590_s5 = inlined_call_operand.vmem [shape: f32[1,128], index: 5, kind: input, shape index: {}]   ;;  %s591_s6 = inlined_call_operand.hbm [shape: f32[256,128], index: 6, kind: input, shape index: {}]   ;;  %s592_s7 = inlined_call_operand.vmem [shape: f32[1,128], index: 7, kind: input, shape index: {}]   ;;  %s593_s8 = inlined_call_operand.hbm [shape: f32[16,128], index: 8, kind: output, shape index: {}]  }
   0x1   :  { %14 = vsyncpa [#allocation7], 0 }
   0x2   :  { %15 = vsyncpa [#allocation5], 0  ;;  %s33_s29 = sshll.u32 %s586_s1, 4  ;;  %s464_s30 = smov [#allocation6]   ;;  %s34_s29 = int_to_ptr.hbm [resolvable:$true] %s33_s29 }
   0x3   :  { %s35_s9 = sshll.u32 %s464_s30, 4  ;;  %s20_s12 = sshll.u32 %s585_s0, 4  ;;  %s36_s9 = int_to_ptr.vmem [resolvable:$true] %s35_s9  ;;  %s21_s12 = int_to_ptr.hbm [resolvable:$true] %s20_s12 }
   0x4   :  { %s465_s13 = smov 128   ;;  %s466_s14 = smov 8  }
   0x5   :  { %41 = dma.hbm_to_vmem [thread:$0]  %s34_s29, 256, %s36_s9, [#allocation7], %s465_s13, %s465_s13, %s466_s14  }
   0x6   :  { %s467_s15 = smov [#allocation3]   ;;  %s54_s1 = sshll.u32 %s591_s6, 4  ;;  %s55_s1 = int_to_ptr.hbm [resolvable:$true] %s54_s1 }
   0x7   :  { %s22_s16 = sshll.u32 %s467_s15, 4  ;;  %s468_s0 = smov [#allocation8]   ;;  %s23_s16 = int_to_ptr.vmem [resolvable:$true] %s22_s16 }
   0x8   :  { %28 = dma.hbm_to_vmem [thread:$0]  %s21_s12, 256, %s23_s16, [#allocation4], %s465_s13, %s465_s13, %s466_s14  }
   0x9   :  { %s56_s19 = sshll.u32 %s468_s0, 4  ;;  %s57_s19 = int_to_ptr.vmem [resolvable:$true] %s56_s19 }
   0xa   :  { %62 = dma.hbm_to_vmem [thread:$0]  %s55_s1, 4096, %s57_s19, [#allocation7], %s465_s13, %s465_s13, %s466_s14  }
   0xb   :  { %458 = dma.done.wait [#allocation4], 256  }
   0xc   :  { %459 = vsyncadd [#allocation4], 4294967040 }
   0xd   :  { %460 = dma.done.wait [#allocation7], 4352  }
   0xe   :  { %461 = vsyncadd [#allocation7], 4294962944  ;;  %v82_v0 = vld [vmem:[#allocation3 + $0x8] sm:$0xff]  ;;  %v81_v1 = vld [vmem:[#allocation3] sm:$0xff]  ;;  %v469_v4 = vmov 128.0   ;;  %s294_s29 = sshll.u32 %s593_s8, 4  ;;  %s295_s29 = int_to_ptr.hbm [resolvable:$true] %s294_s29 }
   0xf   :  { %85 = vadd.xlane.f32.xlu0 %v82_v0  ;;  %83 = vadd.xlane.f32.xlu1 %v81_v1  ;;  %v143_v2 = vld [vmem:[#allocation6 + $0x8] sm:$0xff]  ;;  %v142_v3 = vld [vmem:[#allocation6] sm:$0xff]  ;;  %352 = vrcp.f32 %v469_v4  ;;  %v217_v29 = vld [vmem:[#allocation8 + $0x68] sm:$0xff] }
  0x10   :  { %v219_v7 = vld [vmem:[#allocation8 + $0x78] sm:$0xff]  ;;  %v218_v8 = vld [vmem:[#allocation8 + $0x70] sm:$0xff]  ;;  %v216_v30 = vld [vmem:[#allocation8 + $0x60] sm:$0xff] }
  0x11   :  { %240 = vmatpush.msra.mxu0 %v219_v7  ;;  %308 = vmatpush.msra.mxu2 %v219_v7  ;;  %v215_v31 = vld [vmem:[#allocation8 + $0x58] sm:$0xff]  ;;  %v214_v33 = vld [vmem:[#allocation8 + $0x50] sm:$0xff]  ;;  %v213_v35 = vld [vmem:[#allocation8 + $0x48] sm:$0xff] }
  0x12   :  { %v235_v32 = vld [vmem:[#allocation8 + $0xf8] sm:$0xff]  ;;  %v234_v34 = vld [vmem:[#allocation8 + $0xf0] sm:$0xff]  ;;  %v233_v36 = vld [vmem:[#allocation8 + $0xe8] sm:$0xff] }
  0x13   :  { %241 = vmatpush.msra.mxu0 %v218_v8  ;;  %309 = vmatpush.msra.mxu2 %v218_v8  ;;  %v212_v37 = vld [vmem:[#allocation8 + $0x40] sm:$0xff]  ;;  %v211_v39 = vld [vmem:[#allocation8 + $0x38] sm:$0xff]  ;;  %v210_v41 = vld [vmem:[#allocation8 + $0x30] sm:$0xff] }
  0x14   :  { %263 = vmatpush.msra.mxu1 %v235_v32  ;;  %324 = vmatpush.msra.mxu3 %v235_v32  ;;  %v232_v38 = vld [vmem:[#allocation8 + $0xe0] sm:$0xff]  ;;  %v231_v40 = vld [vmem:[#allocation8 + $0xd8] sm:$0xff]  ;;  %v230_v42 = vld [vmem:[#allocation8 + $0xd0] sm:$0xff] }
  0x15   :  { %v353_v5 = vpop.eup %352  ;;  %242 = vmatpush.msra.mxu0 %v217_v29  ;;  %310 = vmatpush.msra.mxu2 %v217_v29  ;;  %v209_v43 = vld [vmem:[#allocation8 + $0x28] sm:$0xff]  ;;  %v208_v45 = vld [vmem:[#allocation8 + $0x20] sm:$0xff]  ;;  %v207_v47 = vld [vmem:[#allocation8 + $0x18] sm:$0xff] }
  0x16   :  { %v88_v6 = vmul.f32 128.0, %v353_v5  ;;  %vm92_vm0 = vweird.f32 %v353_v5  ;;  %264 = vmatpush.msra.mxu1 %v234_v34  ;;  %325 = vmatpush.msra.mxu3 %v234_v34  ;;  %v229_v44 = vld [vmem:[#allocation8 + $0xc8] sm:$0xff]  ;;  %v228_v46 = vld [vmem:[#allocation8 + $0xc0] sm:$0xff]  ;;  %v227_v48 = vld [vmem:[#allocation8 + $0xb8] sm:$0xff] }
  0x17   :  { %146 = vadd.xlane.f32.xlu0 %v143_v2  ;;  %144 = vadd.xlane.f32.xlu1 %v142_v3  ;;  %v206_v49 = vld [vmem:[#allocation8 + $0x10] sm:$0xff]  ;;  %v205_v51 = vld [vmem:[#allocation8 + $0x8] sm:$0xff]  ;;  %v204_v53 = vld [vmem:[#allocation8] sm:$0xff] }
  0x18   :  { %v89_v9 = vsub.f32 1.0, %v88_v6  ;;  %243 = vmatpush.msra.mxu0 %v216_v30  ;;  %311 = vmatpush.msra.mxu2 %v216_v30  ;;  %v226_v50 = vld [vmem:[#allocation8 + $0xb0] sm:$0xff]  ;;  %v225_v52 = vld [vmem:[#allocation8 + $0xa8] sm:$0xff]  ;;  %v224_v54 = vld [vmem:[#allocation8 + $0xa0] sm:$0xff] }
  0x19   :  { %265 = vmatpush.msra.mxu1 %v233_v36  ;;  %326 = vmatpush.msra.mxu3 %v233_v36  ;;  %v223_v55 = vld [vmem:[#allocation8 + $0x98] sm:$0xff]  ;;  %v222_v56 = vld [vmem:[#allocation8 + $0x90] sm:$0xff]  ;;  %v221_v61 = vld [vmem:[#allocation8 + $0x88] sm:$0xff] }
  0x1a   :  { %v90_v10 = vmul.f32 %v353_v5, %v89_v9  ;;  %244 = vmatpush.msra.mxu0 %v215_v31  ;;  %312 = vmatpush.msra.mxu2 %v215_v31  ;;  %v348_v32 = vld [vmem:[%s588_s3] ss:$0 sm:$0xff] }
  0x1b   :  { %266 = vmatpush.msra.mxu1 %v232_v38  ;;  %327 = vmatpush.msra.mxu3 %v232_v38 }
  0x1c   :  { %v91_v11 = vadd.f32 %v353_v5, %v90_v10  ;;  %245 = vmatpush.msra.mxu0 %v214_v33  ;;  %313 = vmatpush.msra.mxu2 %v214_v33 }
  0x1d   :  { %267 = vmatpush.msra.mxu1 %v231_v40  ;;  %328 = vmatpush.msra.mxu3 %v231_v40 }
  0x1e   :  { %v534_v12 = vsel %vm92_vm0, %v353_v5, %v91_v11  ;;  %246 = vmatpush.msra.mxu0 %v213_v35  ;;  %314 = vmatpush.msra.mxu2 %v213_v35 }
  0x1f   :  { %268 = vmatpush.msra.mxu1 %v230_v42  ;;  %329 = vmatpush.msra.mxu3 %v230_v42  ;;  %v349_v42 = vld [vmem:[%s589_s4] ss:$0 sm:$0xff] }
  0x20   :  { %247 = vmatpush.msra.mxu0 %v212_v37  ;;  %315 = vmatpush.msra.mxu2 %v212_v37 }
  0x21   :  { %269 = vmatpush.msra.mxu1 %v229_v44  ;;  %330 = vmatpush.msra.mxu3 %v229_v44 }
  0x22   :  { %248 = vmatpush.msra.mxu0 %v211_v39  ;;  %316 = vmatpush.msra.mxu2 %v211_v39 }
  0x23   :  { %270 = vmatpush.msra.mxu1 %v228_v46  ;;  %331 = vmatpush.msra.mxu3 %v228_v46 }
  0x24   :  { %249 = vmatpush.msra.mxu0 %v210_v41  ;;  %317 = vmatpush.msra.mxu2 %v210_v41 }
  0x25   :  { %271 = vmatpush.msra.mxu1 %v227_v48  ;;  %332 = vmatpush.msra.mxu3 %v227_v48 }
  0x26   :  { %250 = vmatpush.msra.mxu0 %v209_v43  ;;  %318 = vmatpush.msra.mxu2 %v209_v43 }
  0x27   :  { %272 = vmatpush.msra.mxu1 %v226_v50  ;;  %333 = vmatpush.msra.mxu3 %v226_v50 }
  0x28   :  { %251 = vmatpush.msra.mxu0 %v208_v45  ;;  %319 = vmatpush.msra.mxu2 %v208_v45 }
  0x29   :  { %273 = vmatpush.msra.mxu1 %v225_v52  ;;  %334 = vmatpush.msra.mxu3 %v225_v52 }
  0x2a   :  { %252 = vmatpush.msra.mxu0 %v207_v47  ;;  %320 = vmatpush.msra.mxu2 %v207_v47 }
  0x2b   :  { %274 = vmatpush.msra.mxu1 %v224_v54  ;;  %335 = vmatpush.msra.mxu3 %v224_v54 }
  0x2c   :  { %253 = vmatpush.msra.mxu0 %v206_v49  ;;  %321 = vmatpush.msra.mxu2 %v206_v49 }
  0x2d   :  { %275 = vmatpush.msra.mxu1 %v223_v55  ;;  %336 = vmatpush.msra.mxu3 %v223_v55 }
  0x2e   :  { %254 = vmatpush.msra.mxu0 %v205_v51  ;;  %322 = vmatpush.msra.mxu2 %v205_v51 }
  0x2f   :  { %276 = vmatpush.msra.mxu1 %v222_v56  ;;  %337 = vmatpush.msra.mxu3 %v222_v56 }
  0x30   :  { %255 = vmatpush.msra.mxu0 %v204_v53  ;;  %323 = vmatpush.msra.mxu2 %v204_v53  ;;  %v351_v53 = vld [vmem:[%s592_s7] ss:$0 sm:$0xff] }
  0x31   :  { %277 = vmatpush.msra.mxu1 %v221_v61  ;;  %338 = vmatpush.msra.mxu3 %v221_v61 }
  0x82   :  { %v86_v13 = vpop.xlane.xlu0 %85  ;;  %v84_v14 = vpop.xlane.xlu1 %83 }
  0x83   :  { %v95_v15 = vmul.f32 %v534_v12, %v86_v13  ;;  %v94_v16 = vmul.f32 %v534_v12, %v84_v14 }
  0x85   :  { %v538_v17 = vsub.f32 %v81_v1, %v94_v16  ;;  %v540_v18 = vsub.f32 %v82_v0, %v95_v15  ;;  %v220_v0 = vld [vmem:[#allocation8 + $0x80] sm:$0xff] }
  0x86   :  { %278 = vmatpush.msra.mxu1 %v220_v0  ;;  %339 = vmatpush.msra.mxu3 %v220_v0 }
  0x87   :  { %v99_v19 = vmul.f32 %v540_v18, %v540_v18  ;;  %v98_v20 = vmul.f32 %v538_v17, %v538_v17 }
  0x89   :  { %102 = vadd.xlane.f32.xlu2 %v99_v19  ;;  %100 = vadd.xlane.f32.xlu0 %v98_v20 }
  0x8a   :  { %v147_v21 = vpop.xlane.xlu0 %146  ;;  %v145_v22 = vpop.xlane.xlu1 %144 }
  0x8b   :  { %v149_v23 = vmul.f32 %v147_v21, %v534_v12  ;;  %v148_v24 = vmul.f32 %v145_v22, %v534_v12 }
  0x8d   :  { %v548_v25 = vsub.f32 %v143_v2, %v149_v23  ;;  %v550_v26 = vsub.f32 %v142_v3, %v148_v24 }
  0x8f   :  { %v153_v27 = vmul.f32 %v548_v25, %v548_v25  ;;  %v152_v28 = vmul.f32 %v550_v26, %v550_v26 }
  0x91   :  { %156 = vadd.xlane.f32.xlu2 %v153_v27  ;;  %154 = vadd.xlane.f32.xlu1 %v152_v28 }
  0xfc   :  { %v103_v57 = vpop.xlane.xlu2 %102  ;;  %v101_v58 = vpop.xlane.xlu0 %100 }
  0xfd   :  { %v105_v59 = vmul.f32 %v103_v57, %v534_v12  ;;  %v104_v60 = vmul.f32 %v101_v58, %v534_v12 }
  0xff   :  { %v107_v62 = vadd.f32 1e-05, %v105_v59  ;;  %v106_v63 = vadd.f32 1e-05, %v104_v60 }
 0x101   :  { %354 = vrsqrt.f32 %v107_v62  ;;  %vm114_vm2 = vweird.f32 %v106_v63  ;;  %vm124_vm4 = vweird.f32 %v107_v62 }
 0x102   :  { %356 = vrsqrt.f32 %v106_v63 }
 0x104   :  { %v157_v1 = vpop.xlane.xlu2 %156  ;;  %v155_v2 = vpop.xlane.xlu1 %154 }
 0x105   :  { %v159_v3 = vmul.f32 %v157_v1, %v534_v12  ;;  %v158_v4 = vmul.f32 %v155_v2, %v534_v12  ;;  %v347_v12 = vld [vmem:[%s587_s2] ss:$0 sm:$0xff] }
 0x107   :  { %v355_v5 = vpop.eup %354  ;;  %v161_v6 = vadd.f32 1e-05, %v159_v3  ;;  %v160_v7 = vadd.f32 1e-05, %v158_v4 }
 0x108   :  { %v357_v8 = vpop.eup %356  ;;  %v119_v9 = vmul.f32 %v355_v5, %v107_v62  ;;  %vm125_vm1 = vweird.f32 %v355_v5 }
 0x109   :  { %v109_v10 = vmul.f32 %v357_v8, %v106_v63  ;;  %358 = vrsqrt.f32 %v161_v6  ;;  %vm115_vm3 = vweird.f32 %v357_v8  ;;  %vm126_vm5 = vmor %vm124_vm4, %vm125_vm1  ;;  %vm168_vm8 = vweird.f32 %v160_v7 }
 0x10a   :  { %v120_v11 = vmul.f32 %v355_v5, %v119_v9  ;;  %360 = vrsqrt.f32 %v160_v7  ;;  %vm116_vm6 = vmor %vm114_vm2, %vm115_vm3  ;;  %vm178_vm10 = vweird.f32 %v161_v6 }
 0x10b   :  { %v110_v13 = vmul.f32 %v357_v8, %v109_v10 }
 0x10c   :  { %v121_v14 = vmul.f32 0.5, %v120_v11 }
 0x10d   :  { %v111_v15 = vmul.f32 0.5, %v110_v13 }
 0x10e   :  { %v122_v16 = vsub.f32 1.5, %v121_v14 }
 0x10f   :  { %v359_v19 = vpop.eup %358  ;;  %v112_v20 = vsub.f32 1.5, %v111_v15 }
 0x110   :  { %v361_v21 = vpop.eup %360  ;;  %v123_v22 = vmul.f32 %v355_v5, %v122_v16  ;;  %v173_v23 = vmul.f32 %v359_v19, %v161_v6  ;;  %vm179_vm7 = vweird.f32 %v359_v19 }
 0x111   :  { %v113_v24 = vmul.f32 %v357_v8, %v112_v20  ;;  %v163_v27 = vmul.f32 %v361_v21, %v160_v7  ;;  %vm169_vm9 = vweird.f32 %v361_v21  ;;  %vm180_vm11 = vmor %vm178_vm10, %vm179_vm7 }
 0x112   :  { %v174_v28 = vmul.f32 %v359_v19, %v173_v23  ;;  %v127_v29 = vsel %vm126_vm5, %v355_v5, %v123_v22  ;;  %vm170_vm12 = vmor %vm168_vm8, %vm169_vm9 }
 0x113   :  { %v164_v30 = vmul.f32 %v361_v21, %v163_v27  ;;  %v117_v31 = vsel %vm116_vm6, %v357_v8, %v113_v24  ;;  %v133_v33 = vmul.f32 %v347_v12, %v127_v29 }
 0x114   :  { %v175_v34 = vmul.f32 0.5, %v174_v28  ;;  %v132_v35 = vmul.f32 %v347_v12, %v117_v31 }
 0x115   :  { %v165_v36 = vmul.f32 0.5, %v164_v30  ;;  %v135_v37 = vmul.f32 %v133_v33, %v540_v18 }
 0x116   :  { %v176_v38 = vsub.f32 1.5, %v175_v34  ;;  %v134_v39 = vmul.f32 %v132_v35, %v538_v17  ;;  %v350_v17 = vld [vmem:[%s590_s5] ss:$0 sm:$0xff]  ;;  %s470_s5 = smov [#allocation9]  }
 0x117   :  { %v166_v40 = vsub.f32 1.5, %v165_v36  ;;  %v141_v41 = vadd.f32 %v348_v32, %v135_v37  ;;  %s292_s26 = sshll.u32 %s470_s5, 4  ;;  %s293_s26 = int_to_ptr.vmem [resolvable:$true] %s292_s26 }
 0x118   :  { %v177_v43 = vmul.f32 %v359_v19, %v176_v38  ;;  %v140_v44 = vadd.f32 %v348_v32, %v134_v39 }
 0x119   :  { %v167_v45 = vmul.f32 %v361_v21, %v166_v40  ;;  %259 = vmatmul.f32.vlgmr.msra.gmra.mxu2 %v141_v41 }
 0x11a   :  { %256 = vmatmul.f32.vlgmr.msra.gmra.mxu0 %v140_v44  ;;  %v181_v18 = vsel %vm180_vm11, %v359_v19, %v177_v43 }
 0x11b   :  { %v171_v46 = vsel %vm170_vm12, %v361_v21, %v167_v45  ;;  %v187_v47 = vmul.f32 %v349_v42, %v181_v18 }
 0x11c   :  { %v186_v48 = vmul.f32 %v349_v42, %v171_v46 }
 0x11d   :  { %v189_v49 = vmul.f32 %v187_v47, %v548_v25 }
 0x11e   :  { %v188_v50 = vmul.f32 %v186_v48, %v550_v26 }
 0x11f   :  { %v195_v51 = vadd.f32 %v350_v17, %v189_v49 }
 0x120   :  { %v194_v52 = vadd.f32 %v350_v17, %v188_v50 }
 0x121   :  { %282 = vmatmul.f32.vlgmr.msra.gmra.mxu3 %v195_v51 }
 0x122   :  { %279 = vmatmul.f32.vlgmr.msra.gmra.mxu1 %v194_v52 }
 0x197   :  { %v257_v54 = vpop.f32.mrf.mxu0 }
 0x198   :  { %v258_v55 = vadd.f32 %v351_v53, %v257_v54 }
 0x19c   :  { %v260_v57 = vpop.f32.mrf.mxu2 }
 0x19d   :  { %v261_v25 = vadd.f32 %v351_v53, %v260_v57 }
 0x19f   :  { %v280_v56 = vpop.f32.mrf.mxu1 }
 0x1a0   :  { %v281_v58 = vadd.f32 %v280_v56, %v258_v55 }
 0x1a2   :  { %286 = vst [vmem:[#allocation9] sm:$0xff] %v281_v58 }
 0x1a4   :  { %v283_v26 = vpop.f32.mrf.mxu3 }
 0x1a5   :  { %v284_v59 = vadd.f32 %v283_v26, %v261_v25 }
 0x1a7   :  { %287 = vst [vmem:[#allocation9 + $0x8] sm:$0xff] %v284_v59 }
 0x1a8   :  { %300 = dma.vmem_to_hbm [thread:$0]  %s293_s26, 256, %s295_s29, [#allocation5], %s465_s13, %s465_s13, %s466_s14  }
 0x1a9   :  { %462 = dma.done.wait [#allocation5], 256  }
 0x1aa   :  { %463 = vsyncadd [#allocation5], 4294967040 }
 0x1ab   :  { %305 = vsyncpa [#allocation4], 1 }
 0x1ac   :  { %306 = vsyncpa [#allocation7], 1 }
 0x1ad   :  { %307 = vsyncpa [#allocation5], 1 }

</bundles_post_ra>
